<compile_context>
chip_gen: v7x
topology: tpu7x:2x2x1
jax: 0.10.0
libtpu: 0.0.40
codegen_flags: <defaults>
</compile_context>

<pallas_src>
import functools

import jax
import jax.numpy as jnp
from jax.experimental import pallas as pl
from jax.experimental.pallas import tpu as pltpu

LANES = 128              # TPU lane width (fixed)
TM_MAX_F32_ROWS = 4096   # 4096 rows * 128 lanes * 4 B = 2 MiB per f32 input tile


def _cdiv(a, b):
    return -(-a // b)


def _round_up(a, b):
    return _cdiv(a, b) * b


def _num_tensorcores():
    """Best-effort TensorCores per device (dual-TC: v3/v4/v5p/v7x). Safe default 1."""
    try:
        kind = (jax.devices()[0].device_kind or "").lower()
    except Exception:
        return 1
    if any(m in kind for m in ("v5e", "v5 lite", "v5lite", "v6e", "v6 lite", "v6lite")):
        return 1
    if any(m in kind for m in ("v3", "v4", "v5p", "v7", "tpu7")):
        return 2
    return 1


def _charbonnier_partial_kernel(x_ref, y_ref, out_ref, *, eps, tm, acc_rows,
                                spp, num_blocks, n, guard_dummy, mask_tail):
    """Accumulate per-lane partial sums of sqrt((x-y)^2 + eps) into out_ref."""
    p = pl.program_id(0)          # parallel partition (one per TensorCore)
    s = pl.program_id(1)          # reduction step within the partition
    b = p * spp + s               # logical row-block index

    @pl.when(s == 0)
    def _init():
        out_ref[...] = jnp.zeros_like(out_ref)

    def _accumulate(mask_this_block):
        d = x_ref[...].astype(jnp.float32) - y_ref[...].astype(jnp.float32)
        v = jnp.sqrt(d * d + jnp.float32(eps))
        if mask_this_block:
            # Emitted statically only when a ragged tail exists and executed
            # only for the single last block (see pl.when gating below).
            row = jax.lax.broadcasted_iota(jnp.int32, (tm, LANES), 0)
            lane = jax.lax.broadcasted_iota(jnp.int32, (tm, LANES), 1)
            grow = b * tm + row                 # global row index (<< 2**31)
            full_rows = n // LANES              # rows fully inside [0, n)
            rem = n - full_rows * LANES         # valid lanes in row `full_rows`
            valid = (grow < full_rows) | ((grow == full_rows) & (lane < rem))
            v = jnp.where(valid, v, jnp.float32(0.0))
        # Tile-aligned view (acc_rows is a multiple of 8): acc_rows-row resident
        # accumulator gives acc_rows/8 independent add chains per lane group.
        out_ref[...] += v.reshape(tm // acc_rows, acc_rows, LANES).sum(axis=0)

    if mask_tail:
        pl.when(b < num_blocks - 1)(lambda: _accumulate(False))
        pl.when(b == num_blocks - 1)(lambda: _accumulate(True))
    elif guard_dummy:
        pl.when(b < num_blocks)(lambda: _accumulate(False))
    else:
        _accumulate(False)


def charbonnier_loss(x, y, eps=1e-9, *, _max_block_rows=None):
    """Pallas TPU implementation of CharbonnierLoss.forward(x, y)."""
    assert x.shape == y.shape, "x and y must have the same shape"
    n = int(x.size)
    if n == 0:
        return jnp.float32(float("nan"))   # torch.mean over an empty tensor is NaN
    eps = float(eps)

    xf = jnp.ravel(x)
    yf = jnp.ravel(y)

    itemsize = jnp.dtype(x.dtype).itemsize
    sub = 8 * max(1, 4 // itemsize)        # min sublane tile (f32: 8, bf16/fp16: 16)

    # Lane-dense (rows, 128) view. n % 128 == 0 is a zero-copy reshape; only a
    # truly lane-ragged flat size pays one minimal pad (the unavoidable copy to
    # obtain a contiguous lane-aligned view); all padded / OOB elements are
    # excluded by the gated in-kernel tail mask, so `eps` is honored exactly.
    padded_n = _round_up(n, LANES)
    if padded_n != n:
        xf = jnp.pad(xf, (0, padded_n - n))
        yf = jnp.pad(yf, (0, padded_n - n))
    rows = padded_n // LANES
    x2d = xf.reshape(rows, LANES)
    y2d = yf.reshape(rows, LANES)

    # ~2 MiB per input tile regardless of dtype. Double-buffered footprint:
    # 2 inputs x 2 bufs x 2 MiB = 8 MiB < v5e's 16 MiB scoped-VMEM default.
    tm_max = _max_block_rows or (TM_MAX_F32_ROWS * max(1, 4 // itemsize))
    tm = min(tm_max, _round_up(rows, sub))
    if rows >= (1 << 31) - tm:
        raise ValueError("charbonnier_loss: input too large for int32 row indexing")
    acc_rows = 32 if tm % 32 == 0 else (16 if tm % 16 == 0 else 8)

    num_blocks = _cdiv(rows, tm)
    num_parts = min(_num_tensorcores(), num_blocks)   # 1 on v5e/v6e, 2 on v7x
    spp = _cdiv(num_blocks, num_parts)                # reduction steps per partition
    guard_dummy = (num_parts * spp != num_blocks)     # last partition has dummy steps
    mask_tail = (num_blocks * tm * LANES != n)        # last block has invalid elements

    if guard_dummy:
        def in_map(p, s):
            # Clamp so a dummy trailing step re-reads a valid block; its
            # contribution is skipped by the in-kernel pl.when guard.
            return (jnp.minimum(p * spp + s, num_blocks - 1), 0)
    else:
        def in_map(p, s):
            return (p * spp + s, 0)

    kernel = functools.partial(
        _charbonnier_partial_kernel, eps=eps, tm=tm, acc_rows=acc_rows,
        spp=spp, num_blocks=num_blocks, n=n,
        guard_dummy=guard_dummy, mask_tail=mask_tail)

    partial_sums = pl.pallas_call(
        kernel,
        out_shape=jax.ShapeDtypeStruct((num_parts * acc_rows, LANES), jnp.float32),
        grid_spec=pltpu.PrefetchScalarGridSpec(
            num_scalar_prefetch=0,
            grid=(num_parts, spp),
            in_specs=[
                pl.BlockSpec((tm, LANES), in_map),
                pl.BlockSpec((tm, LANES), in_map),
            ],
            out_specs=pl.BlockSpec((acc_rows, LANES), lambda p, s: (p, 0)),
        ),
        compiler_params=pltpu.CompilerParams(
            dimension_semantics=("parallel", "arbitrary"),
        ),
        cost_estimate=pl.CostEstimate(
            flops=4 * n,
            transcendentals=n,
            bytes_accessed=2 * n * itemsize + num_parts * acc_rows * LANES * 4,
        ),
    )(x2d, y2d)

    total = jnp.sum(partial_sums)          # tiny final cross-lane reduce in plain JAX
    return (total / jnp.float32(n)).astype(jnp.float32)


if __name__ == "__main__":
    key = jax.random.PRNGKey(0)
    kx, ky = jax.random.split(key)

    def _ref(x, y, eps):
        xf = x.astype(jnp.float32)
        yf = y.astype(jnp.float32)
        return jnp.mean(jnp.sqrt((xf - yf) ** 2 + jnp.float32(eps)))

    # 1) Default path: NCHW-style tensor, n % (8*128) aligned, zero-copy.
    shape = (2, 4, 16, 16)
    x = jax.random.normal(kx, shape, dtype=jnp.float32)
    y = jax.random.normal(ky, shape, dtype=jnp.float32)
    eps = 1e-9
    loss = charbonnier_loss(x, y, eps=eps)
    jax.block_until_ready(loss)
    assert jnp.allclose(loss, _ref(x, y, eps), rtol=1e-5, atol=1e-6), (loss, _ref(x, y, eps))

    # 2) Lane-ragged size (n % 128 != 0) and non-default eps.
    x2 = jax.random.normal(kx, (3, 5, 7), dtype=jnp.float32)
    y2 = jax.random.normal(ky, (3, 5, 7), dtype=jnp.float32)
    loss2 = charbonnier_loss(x2, y2, eps=1e-6)
    jax.block_until_ready(loss2)
    assert jnp.allclose(loss2, _ref(x2, y2, 1e-6), rtol=1e-5, atol=1e-6), (loss2, _ref(x2, y2, 1e-6))

    # 3) Multi-block reduction with a masked tail block (and partition split on
    #    dual-TensorCore parts) via a small forced block size.
    x3 = jax.random.normal(kx, (2, 4, 16, 17), dtype=jnp.float32)
    y3 = jax.random.normal(ky, (2, 4, 16, 17), dtype=jnp.float32)
    loss3 = charbonnier_loss(x3, y3, eps=eps, _max_block_rows=8)
    jax.block_until_ready(loss3)
    assert jnp.allclose(loss3, _ref(x3, y3, eps), rtol=1e-5, atol=1e-6), (loss3, _ref(x3, y3, eps))

    # 4) bf16 inputs: loaded at native width, upcast to f32 inside the kernel.
    x4 = jax.random.normal(kx, shape, dtype=jnp.bfloat16)
    y4 = jax.random.normal(ky, shape, dtype=jnp.bfloat16)
    loss4 = charbonnier_loss(x4, y4, eps=eps)
    jax.block_until_ready(loss4)
    assert jnp.allclose(loss4, _ref(x4, y4, eps), rtol=1e-5, atol=1e-6), (loss4, _ref(x4, y4, eps))

    print("KERNEL_OK")
</pallas_src>

<mosaic_0001>
module attributes {stable_mosaic.version = 11 : i64} {
  func.func @_charbonnier_partial_kernel(%arg0: i32, %arg1: i32, %arg2: memref<16x128xf32, #tpu.memory_space<vmem>>, %arg3: memref<16x128xf32, #tpu.memory_space<vmem>>, %arg4: memref<16x128xf32, #tpu.memory_space<vmem>>) attributes {dimension_semantics = [#tpu.dimension_semantics<parallel>, #tpu.dimension_semantics<arbitrary>], iteration_bounds = array<i64: 1, 1>, scalar_prefetch = 0 : i64, scratch_operands = 0 : i64, tpu.core_type = #tpu.core_type<tc>, window_params = [{transform_indices = @transform_0, window_bounds = array<i64: 16, 128>}, {transform_indices = @transform_1, window_bounds = array<i64: 16, 128>}, {transform_indices = @transform_2, window_bounds = array<i64: 16, 128>}]} {
    %c0_i32 = arith.constant 0 : i32
    %0 = arith.cmpi eq, %arg1, %c0_i32 : i32
    %1 = arith.extui %0 : i1 to i32
    %c0_i32_0 = arith.constant 0 : i32
    %2 = arith.cmpi ne, %1, %c0_i32_0 : i32
    scf.if %2 {
      %cst_9 = arith.constant 0.000000e+00 : f32
      %15 = vector.broadcast %cst_9 : f32 to vector<16x128xf32>
      %c0_10 = arith.constant 0 : index
      %c0_11 = arith.constant 0 : index
      %16 = vector.load %arg4[%c0_10, %c0_11] : memref<16x128xf32, #tpu.memory_space<vmem>>, vector<16x128xf32>
      tpu.vector_store %arg4[%c0_10, %c0_11], %15 {strides = array<i32>} : memref<16x128xf32, #tpu.memory_space<vmem>>, vector<16x128xf32>,
    } else {
    }
    %c0 = arith.constant 0 : index
    %c0_1 = arith.constant 0 : index
    %3 = vector.load %arg2[%c0, %c0_1] : memref<16x128xf32, #tpu.memory_space<vmem>>, vector<16x128xf32>
    %c0_2 = arith.constant 0 : index
    %c0_3 = arith.constant 0 : index
    %4 = vector.load %arg3[%c0_2, %c0_3] : memref<16x128xf32, #tpu.memory_space<vmem>>, vector<16x128xf32>
    %5 = arith.subf %3, %4 : vector<16x128xf32>
    %6 = arith.mulf %5, %5 : vector<16x128xf32>
    %cst = arith.constant 9.99999971E-10 : f32
    %7 = vector.broadcast %cst : f32 to vector<16x128xf32>
    %8 = arith.addf %6, %7 : vector<16x128xf32>
    %9 = math.sqrt %8 : vector<16x128xf32>
    %c0_4 = arith.constant 0 : index
    %c0_5 = arith.constant 0 : index
    %10 = vector.load %arg4[%c0_4, %c0_5] : memref<16x128xf32, #tpu.memory_space<vmem>>, vector<16x128xf32>
    %11 = vector.shape_cast %9 : vector<16x128xf32> to vector<1x16x128xf32>
    %cst_6 = arith.constant dense<0.000000e+00> : vector<16x128xf32>
    %12 = vector.multi_reduction <add>, %11, %cst_6 [0] : vector<1x16x128xf32> to vector<16x128xf32>
    %13 = arith.addf %10, %12 : vector<16x128xf32>
    %c0_7 = arith.constant 0 : index
    %c0_8 = arith.constant 0 : index
    %14 = vector.load %arg4[%c0_7, %c0_8] : memref<16x128xf32, #tpu.memory_space<vmem>>, vector<16x128xf32>
    tpu.vector_store %arg4[%c0_7, %c0_8], %13 {strides = array<i32>} : memref<16x128xf32, #tpu.memory_space<vmem>>, vector<16x128xf32>,
    return
  }
  func.func @transform_0(%arg0: i32, %arg1: i32) -> (i32, i32) {
    %c1_i32 = arith.constant 1 : i32
    %0 = arith.muli %arg0, %c1_i32 : i32
    %1 = arith.addi %0, %arg1 : i32
    %c0_i32 = arith.constant 0 : i32
    %c0_i32_0 = arith.constant 0 : i32
    return %1, %c0_i32 : i32, i32
  }
  func.func @transform_1(%arg0: i32, %arg1: i32) -> (i32, i32) {
    %c1_i32 = arith.constant 1 : i32
    %0 = arith.muli %arg0, %c1_i32 : i32
    %1 = arith.addi %0, %arg1 : i32
    %c0_i32 = arith.constant 0 : i32
    %c0_i32_0 = arith.constant 0 : i32
    return %1, %c0_i32 : i32, i32
  }
  func.func @transform_2(%arg0: i32, %arg1: i32) -> (i32, i32) {
    %c0_i32 = arith.constant 0 : i32
    %c0_i32_0 = arith.constant 0 : i32
    return %arg0, %c0_i32 : i32, i32
  }
}

</mosaic_0001>

<bundles_post_ra>
// kernel: tpu_custom_call.1
= control target key start
LH: loop header
LB: loop body
LE: loop exit
PB: predicated region body
PF: predicated region fallthrough
CT: control target
= control target key end

     0   :  { %7 = vsyncpa [#allocation3], 0  ;;  %s255_s0 = inlined_call_operand.hbm [shape: f32[16,128], index: 0, kind: input, shape index: {}]   ;;  %s256_s1 = inlined_call_operand.hbm [shape: f32[16,128], index: 1, kind: input, shape index: {}]   ;;  %s257_s2 = inlined_call_operand.hbm [shape: f32[16,128], index: 2, kind: output, shape index: {}]  }
   0x1   :  { %8 = vsyncpa [#allocation6], 0 }
   0x2   :  { %9 = vsyncpa [#allocation4], 0  ;;  %s190_s9 = smov [#allocation2]   ;;  %s118_s13 = scalar_lea.hbm %s255_s0, 256 }
   0x3   :  { %s19_s10 = sshll.u32 %s190_s9, 4  ;;  %p119_p0 = scmp.ne.s32.totalorder %s255_s0, %s118_s13  ;;  %s20_s10 = int_to_ptr.vmem [resolvable:$true] %s19_s10 }
   0x4   :  { %p122_p1 = scmp.lt.u32.totalorder %s118_s13, %s255_s0 }
   0x6   :  { %p124_p2 = pnand %p122_p1, %p119_p0 }
   0x8   :  { %127 = shalt.err (!%p124_p2)
}
   0x9   :  { %s128_s18 = scalar_lea.vmem %s20_s10, 256  ;;  %p133_p4 = scmp.lt.s32.totalorder %s20_s10, %s20_s10 }
   0xa   :  { %p129_p3 = scmp.ne.s32.totalorder %s20_s10, %s128_s18  ;;  %p134_p5 = scmp.lt.s32.totalorder %s128_s18, %s128_s18 }
   0xc   :  { %p135_p6 = por %p134_p5, %p133_p4 }
   0xe   :  { %p136_p7 = pnand %p135_p6, %p129_p3 }
  0x10   :  { %139 = shalt.err (!%p136_p7)
}
  0x11   :  { %s191_s19 = smov 128   ;;  %s192_s20 = smov 8  }
  0x12   :  { %25 = dma.hbm_to_vmem [thread:$0]  %s255_s0, 256, %s20_s10, [#allocation3], %s191_s19, %s191_s19, %s192_s20  }
  0x13   :  { %s193_s23 = smov [#allocation5]   ;;  %s140_s27 = scalar_lea.hbm %s256_s1, 256 }
  0x14   :  { %s35_s24 = sshll.u32 %s193_s23, 4  ;;  %p141_p8 = scmp.ne.s32.totalorder %s256_s1, %s140_s27  ;;  %s36_s24 = int_to_ptr.vmem [resolvable:$true] %s35_s24 }
  0x15   :  { %p144_p9 = scmp.lt.u32.totalorder %s140_s27, %s256_s1 }
  0x17   :  { %p146_p10 = pnand %p144_p9, %p141_p8 }
  0x19   :  { %149 = shalt.err (!%p146_p10)
}
  0x1a   :  { %s150_s4 = scalar_lea.vmem %s36_s24, 256  ;;  %p155_p12 = scmp.lt.s32.totalorder %s36_s24, %s36_s24 }
  0x1b   :  { %p151_p11 = scmp.ne.s32.totalorder %s36_s24, %s150_s4  ;;  %p156_p13 = scmp.lt.s32.totalorder %s150_s4, %s150_s4 }
  0x1d   :  { %p157_p0 = por %p156_p13, %p155_p12 }
  0x1f   :  { %p158_p1 = pnand %p157_p0, %p151_p11 }
  0x21   :  { %161 = shalt.err (!%p158_p1)
}
  0x22   :  { %41 = dma.hbm_to_vmem [thread:$0]  %s256_s1, 256, %s36_s24, [#allocation6], %s191_s19, %s191_s19, %s192_s20  }
  0x23   :  { %184 = dma.done.wait [#allocation3], 256  }
  0x24   :  { %185 = vsyncadd [#allocation3], 4294967040 }
  0x25   :  { %186 = dma.done.wait [#allocation6], 256  }
  0x26   :  { %187 = vsyncadd [#allocation6], 4294967040  ;;  %v58_v0 = vld [vmem:[#allocation2] sm:$0xff]  ;;  %v60_v1 = vld [vmem:[#allocation5] sm:$0xff]  ;;  %s194_s1 = smov [#allocation7]  }
  0x27   :  { %v59_v2 = vld [vmem:[#allocation2 + $0x8] sm:$0xff]  ;;  %v62_v3 = vsub.f32 %v58_v0, %v60_v1  ;;  %v61_v4 = vld [vmem:[#allocation5 + $0x8] sm:$0xff]  ;;  %s95_s6 = sshll.u32 %s194_s1, 4  ;;  %s96_s6 = int_to_ptr.vmem [resolvable:$true] %s95_s6 }
  0x28   :  { %v63_v5 = vsub.f32 %v59_v2, %v61_v4  ;;  %s162_s7 = scalar_lea.vmem %s96_s6, 256  ;;  %p167_p3 = scmp.lt.s32.totalorder %s96_s6, %s96_s6 }
  0x29   :  { %v64_v6 = vmul.f32 %v62_v3, %v62_v3  ;;  %p163_p2 = scmp.ne.s32.totalorder %s96_s6, %s162_s7  ;;  %p168_p4 = scmp.lt.s32.totalorder %s162_s7, %s162_s7 }
  0x2a   :  { %v65_v7 = vmul.f32 %v63_v5, %v63_v5 }
  0x2b   :  { %v66_v8 = vadd.f32 1e-09, %v64_v6  ;;  %p169_p5 = por %p168_p4, %p167_p3 }
  0x2c   :  { %v67_v9 = vadd.f32 1e-09, %v65_v7 }
  0x2d   :  { %114 = vrsqrt.f32 %v66_v8  ;;  %vm70_vm0 = vcmp.eq.f32.partialorder %v66_v8, inf  ;;  %v73_v11 = vand.u32 2147483648, %v66_v8  ;;  %vm72_vm1 = vcmp.eq.f32.partialorder %v66_v8, 0.0  ;;  %p170_p6 = pnand %p169_p5, %p163_p2 }
  0x2e   :  { %116 = vrsqrt.f32 %v67_v9  ;;  %vm77_vm2 = vcmp.eq.f32.partialorder %v67_v9, inf  ;;  %v80_v14 = vand.u32 2147483648, %v67_v9  ;;  %vm79_vm3 = vcmp.eq.f32.partialorder %v67_v9, 0.0 }
  0x37   :  { %v115_v10 = vpop.eup %114 }
  0x38   :  { %v117_v12 = vpop.eup %116  ;;  %v69_v13 = vmul.f32 %v115_v10, %v66_v8 }
  0x39   :  { %v76_v15 = vmul.f32 %v117_v12, %v67_v9 }
  0x3a   :  { %v71_v16 = vsel %vm70_vm0, %v66_v8, %v69_v13 }
  0x3b   :  { %v74_v17 = vsel %vm72_vm1, %v73_v11, %v71_v16  ;;  %v78_v18 = vsel %vm77_vm2, %v67_v9, %v76_v15 }
  0x3c   :  { %v81_v19 = vsel %vm79_vm3, %v80_v14, %v78_v18  ;;  %88 = vst [vmem:[#allocation7] sm:$0xff] %v74_v17 }
  0x3d   :  { %89 = vst [vmem:[#allocation7 + $0x8] sm:$0xff] %v81_v19 }
  0x3e   :  { %173 = shalt.err (!%p170_p6)
}
  0x3f   :  { %s174_s10 = scalar_lea.hbm %s257_s2, 256 }
  0x40   :  { %p175_p7 = scmp.ne.s32.totalorder %s257_s2, %s174_s10  ;;  %p178_p8 = scmp.lt.u32.totalorder %s174_s10, %s257_s2 }
  0x42   :  { %p180_p9 = pnand %p178_p8, %p175_p7 }
  0x44   :  { %183 = shalt.err (!%p180_p9)
}
  0x45   :  { %101 = dma.vmem_to_hbm [thread:$0]  %s96_s6, 256, %s257_s2, [#allocation4], %s191_s19, %s191_s19, %s192_s20  }
  0x46   :  { %188 = dma.done.wait [#allocation4], 256  }
  0x47   :  { %189 = vsyncadd [#allocation4], 4294967040 }
  0x48   :  { %105 = vsyncpa [#allocation3], 1 }
  0x49   :  { %106 = vsyncpa [#allocation6], 1 }
  0x4a   :  { %107 = vsyncpa [#allocation4], 1 }

</bundles_post_ra>
